<compile_context>
chip_gen: v6e
topology: v6e:2x2x1
jax: 0.10.0
libtpu: 0.0.40
codegen_flags: <defaults>
</compile_context>

<pallas_src>
import functools

import jax
import jax.numpy as jnp
import numpy as np
from jax.experimental import pallas as pl
from jax.experimental.pallas import tpu as pltpu

_LANES = 128


def _detect_num_shards(default=2):
    """Best-effort TensorCore count (the shard axis maps to megacore on v7x)."""
    try:
        info = pltpu.get_tpu_info()
    except Exception:
        return default
    for name in ("num_cores", "num_tensorcores", "tensorcores_per_chip", "core_count"):
        v = getattr(info, name, None)
        if isinstance(v, int) and v >= 1:
            return max(1, min(2, v))
    return default


def _mae_kernel(p_ref, a_ref, o_ref, *, tile_rows, steps, valid_rows):
    # p_ref/a_ref: (tile_rows, 128) input blocks.
    # o_ref: (8, 128) f32 partial-sum accumulator for this shard, resident in
    #        VMEM across the whole reduction (k) axis.
    s = pl.program_id(0)
    k = pl.program_id(1)

    @pl.when(k == 0)
    def _init():
        o_ref[...] = jnp.zeros_like(o_ref)

    # Global row of the first row this (shard, step) is responsible for.
    # Computed UNclamped so that redundant trailing steps (whose index_map was
    # clamped to a valid block) and out-of-range boundary rows contribute 0.
    row0 = (s * steps + k) * tile_rows

    diff = p_ref[...].astype(jnp.float32) - a_ref[...].astype(jnp.float32)
    ad = jnp.abs(diff)

    def _accumulate(x):
        # (tile_rows, 128) -> (8, 128): layout-preserving reshape + vreg adds.
        o_ref[...] += x.reshape(tile_rows // 8, 8, _LANES).sum(axis=0)

    fully_valid = (row0 + tile_rows) <= valid_rows

    @pl.when(fully_valid)
    def _bulk():
        _accumulate(ad)

    @pl.when(jnp.logical_not(fully_valid))
    def _boundary():
        local_row = jax.lax.broadcasted_iota(jnp.int32, (tile_rows, _LANES), 0)
        in_range = (row0 + local_row) < valid_rows
        _accumulate(jnp.where(in_range, ad, 0.0))


def mae_pallas(preds, answer, *, tile_rows_max=8192, num_shards=None):
    assert preds.shape == answer.shape, "preds/answer must have identical shapes"
    numel = int(preds.size)
    if numel == 0:
        return jnp.array(jnp.nan, dtype=jnp.float32)

    if num_shards is None:
        num_shards = _detect_num_shards()

    # Stream in the native (promoted) dtype; upcast to f32 only inside the kernel.
    dt = np.dtype(jnp.result_type(preds.dtype, answer.dtype))
    if dt.itemsize not in (1, 2, 4):
        dt = np.dtype(np.float32)
    p = preds.astype(dt).reshape(-1)     # reshape of contiguous data: free
    a = answer.astype(dt).reshape(-1)

    itemsize = dt.itemsize
    sub = {4: 8, 2: 16, 1: 32}[itemsize]  # minimum sublane tile per dtype
    chunk = sub * _LANES

    pad = (-numel) % chunk
    if pad:
        # TODO(synk): this small-alignment pad still materializes one copy of
        # both inputs; a tiny jnp tail-epilogue + manual 1-D DMA bulk path
        # would remove it.  The aligned (common) case below is zero-copy.
        p = jnp.pad(p, (0, pad))
        a = jnp.pad(a, (0, pad))
    rows = (numel + pad) // _LANES        # multiple of `sub` (zero-pads add 0)

    p2 = p.reshape(rows, _LANES)
    a2 = a.reshape(rows, _LANES)

    rows_per_shard = pl.cdiv(rows, num_shards)
    tile_rows = min(tile_rows_max, ((rows_per_shard + sub - 1) // sub) * sub)
    tile_rows = max(sub, min(tile_rows, rows))   # rows is a multiple of `sub`
    blocks_total = pl.cdiv(rows, tile_rows)
    steps = pl.cdiv(blocks_total, num_shards)

    def in_index(s, k):
        # Clamp so redundant trailing (shard, step) pairs re-read a valid
        # block; the kernel masks their contribution to exactly zero.
        return (jnp.minimum(s * steps + k, blocks_total - 1), 0)

    kernel = functools.partial(
        _mae_kernel, tile_rows=tile_rows, steps=steps, valid_rows=rows)

    cost = pl.CostEstimate(
        flops=3 * numel,
        transcendentals=0,
        bytes_accessed=2 * numel * itemsize + num_shards * 8 * _LANES * 4,
    )

    partial = pl.pallas_call(
        kernel,
        out_shape=jax.ShapeDtypeStruct((num_shards * 8, _LANES), jnp.float32),
        grid=(num_shards, steps),
        in_specs=[
            pl.BlockSpec((tile_rows, _LANES), in_index),
            pl.BlockSpec((tile_rows, _LANES), in_index),
        ],
        out_specs=pl.BlockSpec((8, _LANES), lambda s, k: (s, 0)),
        compiler_params=pltpu.CompilerParams(
            dimension_semantics=("parallel", "arbitrary"),
            vmem_limit_bytes=48 * 1024 * 1024,
        ),
        cost_estimate=cost,
    )(p2, a2)

    # Tiny epilogue: (num_shards*8, 128) f32 partials -> scalar mean over the
    # TRUE element count (pad / masked regions contributed exactly 0).
    return jnp.sum(partial) / numel


if __name__ == "__main__":
    key = jax.random.PRNGKey(0)
    kp, ka, kp2, ka2, kp3, ka3 = jax.random.split(key, 6)

    # 1) Aligned case (numel % 1024 == 0): zero-copy path, no padding.
    preds = jax.random.normal(kp, (2, 4, 16, 16), dtype=jnp.float32)
    answer = jax.random.normal(ka, (2, 4, 16, 16), dtype=jnp.float32)
    out = mae_pallas(preds, answer)
    jax.block_until_ready(out)
    ref = jnp.mean(jnp.abs(preds - answer))
    assert jnp.allclose(out, ref, rtol=1e-5, atol=1e-6), (out, ref)

    # 2) Ragged case (numel = 105): exercises the small alignment pad plus
    #    full in-kernel masking of any redundant shard step.
    preds2 = jax.random.normal(kp2, (3, 5, 7), dtype=jnp.float32)
    answer2 = jax.random.normal(ka2, (3, 5, 7), dtype=jnp.float32)
    out2 = mae_pallas(preds2, answer2)
    jax.block_until_ready(out2)
    ref2 = jnp.mean(jnp.abs(preds2 - answer2))
    assert jnp.allclose(out2, ref2, rtol=1e-5, atol=1e-6), (out2, ref2)

    # 3) Aligned but not a tile multiple (rows = 24): exercises the partial
    #    boundary block handled by the in-kernel row mask (still no padding).
    preds3 = jax.random.normal(kp3, (3, 8, 128), dtype=jnp.float32)
    answer3 = jax.random.normal(ka3, (3, 8, 128), dtype=jnp.float32)
    out3 = mae_pallas(preds3, answer3)
    jax.block_until_ready(out3)
    ref3 = jnp.mean(jnp.abs(preds3 - answer3))
    assert jnp.allclose(out3, ref3, rtol=1e-5, atol=1e-6), (out3, ref3)

    print("KERNEL_OK")
</pallas_src>

<mosaic_0001>
module attributes {stable_mosaic.version = 11 : i64} {
  func.func @_mae_kernel(%arg0: i32, %arg1: i32, %arg2: memref<8x128xf32, #tpu.memory_space<vmem>>, %arg3: memref<8x128xf32, #tpu.memory_space<vmem>>, %arg4: memref<8x128xf32, #tpu.memory_space<vmem>>) attributes {dimension_semantics = [#tpu.dimension_semantics<parallel>, #tpu.dimension_semantics<arbitrary>], iteration_bounds = array<i64: 2, 1>, scalar_prefetch = 0 : i64, scratch_operands = 0 : i64, tpu.core_type = #tpu.core_type<tc>, window_params = [{transform_indices = @transform_0, window_bounds = array<i64: 8, 128>}, {transform_indices = @transform_1, window_bounds = array<i64: 8, 128>}, {transform_indices = @transform_2, window_bounds = array<i64: 8, 128>}]} {
    %c0_i32 = arith.constant 0 : i32
    %0 = arith.cmpi eq, %arg1, %c0_i32 : i32
    %1 = arith.extui %0 : i1 to i32
    %c0_i32_0 = arith.constant 0 : i32
    %2 = arith.cmpi ne, %1, %c0_i32_0 : i32
    scf.if %2 {
      %cst = arith.constant 0.000000e+00 : f32
      %17 = vector.broadcast %cst : f32 to vector<8x128xf32>
      %c0_7 = arith.constant 0 : index
      %c0_8 = arith.constant 0 : index
      %18 = vector.load %arg4[%c0_7, %c0_8] : memref<8x128xf32, #tpu.memory_space<vmem>>, vector<8x128xf32>
      tpu.vector_store %arg4[%c0_7, %c0_8], %17 {strides = array<i32>} : memref<8x128xf32, #tpu.memory_space<vmem>>, vector<8x128xf32>,
    } else {
    }
    %c1_i32 = arith.constant 1 : i32
    %3 = arith.muli %arg0, %c1_i32 : i32
    %4 = arith.addi %3, %arg1 : i32
    %c8_i32 = arith.constant 8 : i32
    %5 = arith.muli %4, %c8_i32 : i32
    %c0 = arith.constant 0 : index
    %c0_1 = arith.constant 0 : index
    %6 = vector.load %arg2[%c0, %c0_1] : memref<8x128xf32, #tpu.memory_space<vmem>>, vector<8x128xf32>
    %c0_2 = arith.constant 0 : index
    %c0_3 = arith.constant 0 : index
    %7 = vector.load %arg3[%c0_2, %c0_3] : memref<8x128xf32, #tpu.memory_space<vmem>>, vector<8x128xf32>
    %8 = arith.subf %6, %7 : vector<8x128xf32>
    %9 = math.absf %8 : vector<8x128xf32>
    %c8_i32_4 = arith.constant 8 : i32
    %10 = arith.addi %5, %c8_i32_4 : i32
    %c16_i32 = arith.constant 16 : i32
    %11 = arith.cmpi sle, %10, %c16_i32 : i32
    %12 = arith.extui %11 : i1 to i32
    %c0_i32_5 = arith.constant 0 : i32
    %13 = arith.cmpi ne, %12, %c0_i32_5 : i32
    scf.if %13 {
      %c0_7 = arith.constant 0 : index
      %c0_8 = arith.constant 0 : index
      %17 = vector.load %arg4[%c0_7, %c0_8] : memref<8x128xf32, #tpu.memory_space<vmem>>, vector<8x128xf32>
      %18 = vector.shape_cast %9 : vector<8x128xf32> to vector<1x8x128xf32>
      %cst = arith.constant dense<0.000000e+00> : vector<8x128xf32>
      %19 = vector.multi_reduction <add>, %18, %cst [0] : vector<1x8x128xf32> to vector<8x128xf32>
      %20 = arith.addf %17, %19 : vector<8x128xf32>
      %c0_9 = arith.constant 0 : index
      %c0_10 = arith.constant 0 : index
      %21 = vector.load %arg4[%c0_9, %c0_10] : memref<8x128xf32, #tpu.memory_space<vmem>>, vector<8x128xf32>
      tpu.vector_store %arg4[%c0_9, %c0_10], %20 {strides = array<i32>} : memref<8x128xf32, #tpu.memory_space<vmem>>, vector<8x128xf32>,
    } else {
    }
    %true = arith.constant true
    %14 = arith.xori %11, %true : i1
    %15 = arith.extui %14 : i1 to i32
    %c0_i32_6 = arith.constant 0 : i32
    %16 = arith.cmpi ne, %15, %c0_i32_6 : i32
    scf.if %16 {
      %17 = tpu.iota {dimensions = array<i32: 0>} : vector<8x128xi32>
      %18 = vector.broadcast %5 : i32 to vector<8x128xi32>
      %19 = arith.addi %18, %17 : vector<8x128xi32>
      %c16_i32_7 = arith.constant 16 : i32
      %20 = vector.broadcast %c16_i32_7 : i32 to vector<8x128xi32>
      %21 = arith.cmpi slt, %19, %20 : vector<8x128xi32>
      %cst = arith.constant 0.000000e+00 : f32
      %22 = vector.broadcast %cst : f32 to vector<8x128xf32>
      %23 = arith.select %21, %9, %22 : vector<8x128xi1>, vector<8x128xf32>
      %c0_8 = arith.constant 0 : index
      %c0_9 = arith.constant 0 : index
      %24 = vector.load %arg4[%c0_8, %c0_9] : memref<8x128xf32, #tpu.memory_space<vmem>>, vector<8x128xf32>
      %25 = vector.shape_cast %23 : vector<8x128xf32> to vector<1x8x128xf32>
      %cst_10 = arith.constant dense<0.000000e+00> : vector<8x128xf32>
      %26 = vector.multi_reduction <add>, %25, %cst_10 [0] : vector<1x8x128xf32> to vector<8x128xf32>
      %27 = arith.addf %24, %26 : vector<8x128xf32>
      %c0_11 = arith.constant 0 : index
      %c0_12 = arith.constant 0 : index
      %28 = vector.load %arg4[%c0_11, %c0_12] : memref<8x128xf32, #tpu.memory_space<vmem>>, vector<8x128xf32>
      tpu.vector_store %arg4[%c0_11, %c0_12], %27 {strides = array<i32>} : memref<8x128xf32, #tpu.memory_space<vmem>>, vector<8x128xf32>,
    } else {
    }
    return
  }
  func.func @transform_0(%arg0: i32, %arg1: i32) -> (i32, i32) {
    %c1_i32 = arith.constant 1 : i32
    %0 = arith.muli %arg0, %c1_i32 : i32
    %1 = arith.addi %0, %arg1 : i32
    %c1_i32_0 = arith.constant 1 : i32
    %2 = arith.minsi %1, %c1_i32_0 : i32
    %c0_i32 = arith.constant 0 : i32
    %c0_i32_1 = arith.constant 0 : i32
    return %2, %c0_i32 : i32, i32
  }
  func.func @transform_1(%arg0: i32, %arg1: i32) -> (i32, i32) {
    %c1_i32 = arith.constant 1 : i32
    %0 = arith.muli %arg0, %c1_i32 : i32
    %1 = arith.addi %0, %arg1 : i32
    %c1_i32_0 = arith.constant 1 : i32
    %2 = arith.minsi %1, %c1_i32_0 : i32
    %c0_i32 = arith.constant 0 : i32
    %c0_i32_1 = arith.constant 0 : i32
    return %2, %c0_i32 : i32, i32
  }
  func.func @transform_2(%arg0: i32, %arg1: i32) -> (i32, i32) {
    %c0_i32 = arith.constant 0 : i32
    %c0_i32_0 = arith.constant 0 : i32
    return %arg0, %c0_i32 : i32, i32
  }
}

</mosaic_0001>

<bundles_post_ra>
// kernel: tpu_custom_call.1
= control target key start
LH: loop header
LB: loop body
LE: loop exit
PB: predicated region body
PF: predicated region fallthrough
CT: control target
= control target key end

     0   :  { %s874_s0 = inlined_call_operand.hbm [shape: f32[16,128], index: 0, kind: input, shape index: {}]   ;;  %s875_s1 = inlined_call_operand.hbm [shape: f32[16,128], index: 1, kind: input, shape index: {}]   ;;  %s876_s2 = inlined_call_operand.hbm [shape: f32[16,128], index: 2, kind: output, shape index: {}]  }
   0x1   :  { %877 = sst [smem:[#allocation11_spill]] %s874_s0 }
   0x2   :  { %7 = vsyncpa [#allocation3], 0 }
   0x3   :  { %9 = vsyncpa [#allocation3 + $0x1], 0 }
   0x4   :  { %10 = vsyncpa [#allocation6], 0 }
   0x5   :  { %12 = vsyncpa [#allocation6 + $0x1], 0 }
   0x6   :  { %13 = vsyncpa [#allocation4], 0 }
   0x7   :  { %15 = vsyncpa [#allocation4 + $0x1], 0  ;;  %s677_s9 = smov 0   ;;  %s679_s10 = smov 0  }
   0x8   :  { %s681_s11 = smov 0   ;;  %s683_s12 = smov 0  }
   0x9   :  { %s685_s13 = smov 0   ;;  %s687_s14 = smov 0  }
   0xa   :  { %s689_s15 = smov 0   ;;  %s691_s16 = smov 0  }
   0xb   :  { %s693_s17 = smov 0  }
   0xc LB: > { %s381_s18 = sadd.s32 4294967295, %s656_s17   ;;  %s382_s19 = sadd.s32 4294967294, %s656_s17   ;;  %s656_s17 = sphi %s693_s17, %s21_s17   ;;  %s652_s16 = sphi %s691_s16, %s893_s16   ;;  %s648_s15 = sphi %s689_s15, %s892_s15   ;;  %s644_s14 = sphi %s687_s14, %s891_s14   ;;  %s640_s13 = sphi %s685_s13, %s890_s13   ;;  %s636_s12 = sphi %s683_s12, %s889_s12   ;;  %s632_s11 = sphi %s681_s11, %s888_s11   ;;  %s628_s10 = sphi %s679_s10, %s887_s10   ;;  %s624_s9 = sphi %s677_s9, %s886_s9  }
   0xd   : > { %s33_s20 = sadd.s32 1, %s652_s16  ;;  %p38_p0 = scmp.lt.s32.totalorder %s652_s16, 1 }
   0xe   : > { %p35_p1 = scmp.ge.s32.totalorder %s33_s20, 2  ;;  %s46_s21 = sadd.s32 1, %s644_s14 }
   0xf   : > { %s726_s22 = scalar_select %p38_p0, %s652_s16, 1 }
  0x10   : > { %s895_s20 = smov (%p35_p1, %s33_s20), 0  ;;  %p53_p2 = scmp.ne.s32.totalorder %s644_s14, %s640_s13 }
  0x11   : > { %p54_p3 = scmp.eq.s32.totalorder %s656_s17, 0  ;;  %p41_p4 = scmp.lt.s32.totalorder %s895_s20, 1 }
  0x12   : > { %p59_p5 = scmp.ne.s32.totalorder %s640_s13, %s636_s12  ;;  %p60_p7 = scmp.eq.s32.totalorder %s381_s18, 0 }
  0x13   : > { %p735_p6 = por %p54_p3, %p53_p2  ;;  %s101_s26 = ssub.s32 %s652_s16, %s895_s20 }
  0x14   : > { %s42_s24 = scalar_select %p41_p4, %s895_s20, 1 }
  0x15   : > { %p740_p8 = por %p60_p7, %p59_p5  ;;  %p102_p9 = scmp.eq.s32.totalorder %s101_s26, 0 }
  0x16   : > { %s43_s27 = ssub.s32 %s726_s22, %s42_s24  ;;  %s104_s28 = sadd.s32 1, %s632_s11 }
  0x17   : > { %p44_p10 = scmp.eq.s32.totalorder %s43_s27, 0  ;;  %p114_p11 = scmp.ne.s32.totalorder %s632_s11, %s628_s10 }
  0x18   : > { %s749_s29 = scalar_select %p102_p9, %s632_s11, %s104_s28  }
  0x19   : > { %s752_s30 = scalar_select %p44_p10, %s644_s14, %s46_s21  }
  0x1a   : > { %p115_p12 = scmp.eq.s32.totalorder %s381_s18, 1  ;;  %p120_p13 = scmp.ne.s32.totalorder %s628_s10, %s624_s9 }
  0x1b   : > { %p121_p0 = scmp.eq.s32.totalorder %s382_s19, 1  ;;  %p417_p4 = scmp.lt.s32.totalorder %s656_s17, 2 }
  0x1c   : > { %p758_p1 = por %p115_p12, %p114_p11  ;;  %s769_s5 = sand.u32 1, %s644_s14  }
  0x1d   : > { %p763_p3 = por %p121_p0, %p120_p13  ;;  %s386_s6 = sshll.u32 %s726_s22, 7 }
  0x1e   : > { %s385_s7 = sshll.u32 %s769_s5, 3  ;;  %s882_s0 = sld [smem:[#allocation11_spill]] }
  0x1f   : > { %s145_s19 = scalar_lea.vmem [#allocation2], %s385_s7  ;;  %p778_p5 = pnand %p417_p4, %p735_p6 }
  0x20   : > { %s155_s21 = sshll.u32 %s145_s19, 4  ;;  %p389_p7 = scmp.ge.s32.totalorder %s656_s17, 1  ;;  %s156_s21 = int_to_ptr.vmem [resolvable:$true] %s155_s21 }
  0x21   : > { %p181_p9 = scmp.lt.s32.totalorder %s656_s17, 3  ;;  %s142_s26 = scalar_lea.sflag [#allocation3], %s769_s5 }
  0x22   : > { %p494_p10 = pneg %p778_p5  ;;  %s505_s22 = scalar_lea.vmem %s156_s21, 128 }
  0x23   : > { %p506_p11 = scmp.ne.s32.totalorder %s156_s21, %s505_s22  ;;  %s658_s27 = smov [#allocation2]  }
  0x24   : > { %s153_s18 = scalar_lea.hbm %s882_s0, %s386_s6  ;;  %s510_s23 = sshll.u32 %s658_s27, 4  ;;  %s511_s23 = int_to_ptr.vmem [resolvable:$false] %s510_s23 }
  0x25   : > { %p508_p12 = pnand %p506_p11, %p494_p10  ;;  %s512_s28 = scalar_lea.vmem %s511_s23, 256 }
  0x26   : > { %p513_p6 = scmp.lt.s32.totalorder %s156_s21, %s511_s23  ;;  %p514_p0 = scmp.lt.s32.totalorder %s512_s28, %s505_s22 }
  0x27   : > { %p509_p13 = pneg %p508_p12 }
  0x28   : > { %p515_p4 = por %p514_p0, %p513_p6 }
  0x2a   : > { %p516_p2 = pnand %p515_p4, %p509_p13 }
  0x2c   : > { %519 = shalt.err (!%p516_p2)
}
  0x2d   : > { %409 = dma.hbm_to_vmem [thread:$0]  (!%p778_p5), %s153_s18, 128, %s156_s21, %s142_s26  }
  0x2e   : > { %p796_p11 = pnand %p389_p7, %p181_p9  ;;  %s174_s22 = scalar_lea.hbm %s875_s1, %s386_s6 }
  0x2f   : > { %s166_s27 = scalar_lea.vmem [#allocation5], %s385_s7  ;;  %s163_s28 = scalar_lea.sflag [#allocation6], %s769_s5 }
  0x30   : > { %s176_s23 = sshll.u32 %s166_s27, 4  ;;  %s659_s18 = smov [#allocation5]   ;;  %s177_s23 = int_to_ptr.vmem [resolvable:$true] %s176_s23 }
  0x31   : > { %s533_s0 = scalar_lea.vmem %s177_s23, 128  ;;  %s538_s21 = sshll.u32 %s659_s18, 4  ;;  %s539_s21 = int_to_ptr.vmem [resolvable:$false] %s538_s21 }
  0x32   : > { %p534_p2 = scmp.ne.s32.totalorder %s177_s23, %s533_s0  ;;  %s540_s26 = scalar_lea.vmem %s539_s21, 256 }
  0x33   : > { %p541_p7 = scmp.lt.s32.totalorder %s177_s23, %s539_s21  ;;  %p542_p9 = scmp.lt.s32.totalorder %s540_s26, %s533_s0 }
  0x34   : > { %p536_p12 = pnand %p534_p2, %p494_p10 }
  0x35   : > { %p543_p6 = por %p542_p9, %p541_p7 }
  0x36   : > { %p537_p13 = pneg %p536_p12 }
  0x38   : > { %p544_p0 = pnand %p543_p6, %p537_p13 }
  0x3a   : > { %547 = shalt.err (!%p544_p0)
}
  0x3b   : > { %412 = dma.hbm_to_vmem [thread:$0]  (!%p778_p5), %s174_s22, 128, %s177_s23, %s163_s28  }
  0x3c   : > { %185 = sbr.rel (%p796_p11) target bundleno = 123 (0x7b), region = 28  ;;  %s187_s5 = sand.u32 (!%p796_p11), 1, %s640_s13  }
  0x3d   : > { %s390_s6 = sshll.u32 (!%p796_p11), %s187_s5, 3  ;;  %s188_s7 = scalar_lea.sflag (!%p796_p11), [#allocation3], %s187_s5 }
  0x3e   : > { %s191_s12 = scalar_lea.vmem (!%p796_p11), [#allocation2], %s390_s6 }
  0x41   : > { %611 = dma.done.wait (%p740_p8), %s188_s7, 128  }
  0x42   : > { %613 = vsyncadd (%p740_p8), %s188_s7, 4294967168  ;;  %s197_s0 = scalar_lea.sflag [#allocation6], %s187_s5  ;;  %s200_s19 = scalar_lea.vmem [#allocation5], %s390_s6 }
  0x43   : > { %615 = dma.done.wait (%p740_p8), %s197_s0, 128  }
  0x44   : > { %617 = vsyncadd (%p740_p8), %s197_s0, 4294967168  ;;  %s223_s24 = sand.u32 1, %s628_s10   ;;  %s393_s8 = sshll.u32 %s648_s15, 3  ;;  %v660_v0 = vmov 0.0   ;;  %v239_v1 = vld [vmem:[%s191_s12] sm:$0xff]  ;;  %v240_v2 = vld [vmem:[%s200_s19] sm:$0xff] }
  0x45   : > { %s392_s22 = sshll.u32 %s223_s24, 3  ;;  %s243_s27 = sadd.s32 8, %s393_s8  ;;  %v241_v3 = vsub.f32 %v239_v1, %v240_v2 }
  0x46   : > { %s225_s23 = scalar_lea.vmem [#allocation7], %s392_s22  ;;  %p394_p5 = scmp.gt.s32.totalorder %s243_s27, 16 }
  0x47   : > { %236 = vst [vmem:[%s225_s23] sm:$0xff] %v660_v0  ;;  %v242_v4 = vand.u32 2147483647, %v241_v3 }
  0x48   : > { %247 = sbr.rel (%p394_p5) target bundleno = 82 (0x52), region = 44 }
  0x4e   : > { %v248_v5 = vld [vmem:[%s225_s23] sm:$0xff] }
  0x4f   : > { %v250_v6 = vadd.f32 %v248_v5, %v242_v4 }
  0x51   : > { %251 = vst [vmem:[%s225_s23] sm:$0xff] %v250_v6 }
  0x52 PF: > { %p395_p8 = scmp.le.s32.totalorder %s243_s27, 16 }
  0x54   : > { %255 = sbr.rel (%p395_p8) target bundleno = 100 (0x64), region = 48 }
  0x59   : > { %v256_v7 = vlaneseq  ;;  %v258_v8 = vstv %s393_s8  ;;  %v262_v11 = vld [vmem:[%s225_s23] sm:$0xff] }
  0x5b   : > { %v257_v9 = vshrl.u32 %v256_v7, 7 }
  0x5d   : > { %v259_v10 = vadd.s32 %v258_v8, %v257_v9 }
  0x5f   : > { %vm260_vm0 = vcmp.lt.s32.totalorder %v259_v10, 16 }
  0x60   : > { %v261_v12 = vsel %vm260_vm0, %v242_v4, 0.0 }
  0x61   : > { %v264_v13 = vadd.f32 %v262_v11, %v261_v12 }
  0x63   : > { %265 = vst [vmem:[%s225_s23] sm:$0xff] %v264_v13 }
  0x64 PF: > { %s397_s25 = sshll.u32 %s648_s15, 7  ;;  %s280_s26 = sshll.u32 %s225_s23, 4  ;;  %s281_s26 = int_to_ptr.vmem [resolvable:$true] %s280_s26 }
  0x65   : > { %s278_s21 = scalar_lea.hbm %s876_s2, %s397_s25  ;;  %s267_s5 = scalar_lea.sflag [#allocation4], %s223_s24 }
  0x66   : > { %s548_s6 = scalar_lea.vmem %s281_s26, 128  ;;  %s661_s7 = smov [#allocation7]  }
  0x67   : > { %p549_p10 = scmp.ne.s32.totalorder %s281_s26, %s548_s6  ;;  %s552_s12 = sshll.u32 %s661_s7, 4  ;;  %s553_s12 = int_to_ptr.vmem [resolvable:$false] %s552_s12 }
  0x68   : > { %s554_s0 = scalar_lea.vmem %s553_s12, 256  ;;  %p555_p2 = scmp.lt.s32.totalorder %s281_s26, %s553_s12 }
  0x69   : > { %p550_p4 = pnand %p549_p10, %p758_p1  ;;  %p556_p12 = scmp.lt.s32.totalorder %s554_s0, %s548_s6 }
  0x6b   : > { %p551_p11 = pneg %p550_p4  ;;  %p557_p13 = por %p556_p12, %p555_p2 }
  0x6d   : > { %p558_p7 = pnand %p557_p13, %p551_p11 }
  0x6f   : > { %561 = shalt.err (!%p558_p7)
}
  0x70   : > { %s562_s15 = scalar_lea.hbm %s278_s21, 128  ;;  %s566_s8 = scalar_lea.hbm %s876_s2, 256 }
  0x71   : > { %p563_p9 = scmp.ne.s32.totalorder %s278_s21, %s562_s15  ;;  %p567_p5 = scmp.lt.s32.totalorder %s278_s21, %s876_s2 }
  0x72   : > { %p568_p8 = scmp.lt.s32.totalorder %s566_s8, %s562_s15 }
  0x73   : > { %p564_p6 = pnand %p563_p9, %p758_p1 }
  0x74   : > { %p569_p10 = por %p568_p8, %p567_p5 }
  0x75   : > { %p565_p0 = pneg %p564_p6 }
  0x77   : > { %p570_p4 = pnand %p569_p10, %p565_p0 }
  0x79   : > { %573 = shalt.err (!%p570_p4)
}
  0x7a   : > { %404 = dma.vmem_to_hbm [thread:$0]  (%p758_p1), %s281_s26, 128, %s278_s21, %s267_s5  }
  0x7b PF: > { %s292_s23 = sand.u32 1, %s624_s9   ;;  %p885_p11 = scmp.ge.s32.totalorder %s656_s17, 2 }
  0x7c   : > { %s293_s25 = scalar_lea.sflag [#allocation4], %s292_s23 }
  0x7d   : > { %p414_p2 = pnand %p885_p11, %p763_p3 }
  0x7f   : > { %p415_p12 = pneg %p414_p2 }
  0x81   : > { %619 = dma.done.wait (%p415_p12), %s293_s25, 128  }
  0x82   : > { %621 = vsyncadd (%p415_p12), %s293_s25, 4294967168  ;;  %s21_s17 = sadd.s32 1, %s656_s17   ;;  %s886_s9 = smov %s628_s10 }
  0x83   : > { %p18_p13 = scmp.ge.s32.totalorder %s21_s17, 4   ;;  %s887_s10 = smov %s632_s11 }
  0x84   : > { %s888_s11 = smov %s749_s29  ;;  %s889_s12 = smov %s640_s13 }
  0x85   : > { %s890_s13 = smov %s644_s14  ;;  %s891_s14 = smov %s752_s30 }
  0x86   : > { %s892_s15 = smov %s652_s16  ;;  %s893_s16 = smov %s895_s20 }
  0x87   :  { %20 = sbr.rel (!%p18_p13) target bundleno = 12 (0xc), region = 98 }
  0x8c   :  { %298 = vsyncpa [#allocation3], 1 }
  0x8d   :  { %300 = vsyncpa [#allocation3 + $0x1], 1 }
  0x8e   :  { %301 = vsyncpa [#allocation6], 1 }
  0x8f   :  { %303 = vsyncpa [#allocation6 + $0x1], 1 }
  0x90   :  { %304 = vsyncpa [#allocation4], 1 }
  0x91   :  { %306 = vsyncpa [#allocation4 + $0x1], 1 }

</bundles_post_ra>
